<compile_context>
chip_gen: v6e
topology: v6e:2x2x1
jax: 0.10.0
libtpu: 0.0.40
codegen_flags: <defaults>
</compile_context>

<pallas_src>
import functools

import jax
import jax.numpy as jnp
from jax.experimental import pallas as pl
from jax.experimental.pallas import tpu as pltpu

_LANE = 128
_SUBLANE = 8


def _round_up(x: int, m: int) -> int:
    return ((x + m - 1) // m) * m


# ----------------------------------------------------------------------------- kernel
def _categorical_mlp_kernel(n_layers: int, *refs):
    """refs = [x, w_0, b_0, ..., w_{L-1}, b_{L-1}, out].

    Computes h = ReLU(h @ w_l + b_l) for l < L-1, and logits = h @ w_{L-1} + b_{L-1}.
    Every operand is lane-dense (padded to a multiple of 128 in the wrapper/init).
    """
    x_ref = refs[0]
    out_ref = refs[-1]

    h = x_ref[...]
    for l in range(n_layers):
        w_ref = refs[1 + 2 * l]
        b_ref = refs[2 + 2 * l]
        h = jnp.dot(h.astype(w_ref.dtype), w_ref[...],
                    preferred_element_type=jnp.float32) + b_ref[...]
        if l < n_layers - 1:
            h = jnp.maximum(h, 0.0)  # ReLU (default activation of build_mlp)
    out_ref[...] = h.astype(out_ref.dtype)


# ----------------------------------------------------------------------------- params
def init_categorical_net_params(key, input_dim, *, action_dim, hidden_dim,
                                hidden_depth, last_layer_gain=0.01,
                                dtype=jnp.float32):
    """Mirror build_mlp_distribution_net init: orthogonal weights (gain=sqrt(2) for
    relu), zero biases, last layer orthogonal with gain=last_layer_gain.

    Weights are stored as (in, out) so the kernel does x @ W, and a lane-dense
    (128-padded) copy of every weight/bias is precomputed offline.
    """
    if hidden_depth == 0:
        dims = [(input_dim, action_dim)]
    else:
        # Intended Linear chain: in->hidden, (hidden->hidden)*(depth-1), hidden->out.
        # TODO(synk): the PyTorch source has a bug for hidden_depth > 1
        # (nn.Linear(hidden_depth, hidden_dim)); we use the intended hidden_dim chain.
        dims = ([(input_dim, hidden_dim)]
                + [(hidden_dim, hidden_dim)] * (hidden_depth - 1)
                + [(hidden_dim, action_dim)])

    relu_gain = float(jnp.sqrt(2.0))  # nn.init.calculate_gain('relu')
    keys = jax.random.split(key, len(dims))

    layers, padded = [], []
    for i, (din, dout) in enumerate(dims):
        gain = (last_layer_gain if (i == len(dims) - 1 and last_layer_gain)
                else relu_gain)
        w = jax.nn.initializers.orthogonal(scale=gain)(keys[i], (din, dout),
                                                       jnp.float32).astype(dtype)
        b = jnp.zeros((1, dout), dtype)
        layers.append((w, b))

        # lane-dense padded copies (zeros are exact through matmul + ReLU)
        dinp, doutp = _round_up(din, _LANE), _round_up(dout, _LANE)
        wp = jnp.zeros((dinp, doutp), dtype).at[:din, :dout].set(w)
        bp = jnp.zeros((1, doutp), dtype).at[:, :dout].set(b)
        padded.append((wp, bp))

    return {"layers": layers, "padded": padded,
            "input_dim": input_dim, "action_dim": action_dim}


# ----------------------------------------------------------------------------- forward
def categorical_net_logits(x, params, *, interpret=False):
    """Run the fused MLP kernel; returns logits of shape (batch, action_dim)."""
    padded_layers = params["padded"]
    n_layers = len(padded_layers)
    action_dim = params["action_dim"]

    batch, in_dim = x.shape
    in_dim_p = padded_layers[0][0].shape[0]
    out_dim_p = padded_layers[-1][0].shape[1]

    # Lane-dense input: zero-pad the feature axis (exact: matching W rows are zero).
    if in_dim_p != in_dim:
        x = jnp.pad(x, ((0, 0), (0, in_dim_p - in_dim)))

    # Batch tiling: shard rows across a parallel grid (keeps both v7x TCs busy and
    # bounds per-step VMEM when batch grows); tiny batches round up to the sublane.
    tb = 256 if batch >= 256 else _round_up(batch, _SUBLANE)
    bpad = _round_up(batch, tb)
    if bpad != batch:
        x = jnp.pad(x, ((0, bpad - batch), (0, 0)))

    operands = [x]
    in_specs = [pl.BlockSpec((tb, in_dim_p), lambda i: (i, 0))]
    for (w, b) in padded_layers:
        operands += [w, b]
        in_specs += [pl.BlockSpec(w.shape, lambda i: (0, 0)),   # weights stay resident
                     pl.BlockSpec(b.shape, lambda i: (0, 0))]

    kernel = functools.partial(_categorical_mlp_kernel, n_layers)
    out = pl.pallas_call(
        kernel,
        out_shape=jax.ShapeDtypeStruct((bpad, out_dim_p), jnp.float32),
        grid=(bpad // tb,),
        in_specs=in_specs,
        out_specs=pl.BlockSpec((tb, out_dim_p), lambda i: (i, 0)),
        compiler_params=pltpu.CompilerParams(dimension_semantics=("parallel",)),
        interpret=interpret,
    )(*operands)

    # Slice off batch / lane padding.
    return out[:batch, :action_dim]


class Categorical:
    """Thin JAX mirror of torch.distributions.Categorical (logits param)."""

    def __init__(self, logits):
        self.logits = logits - jax.scipy.special.logsumexp(
            logits, axis=-1, keepdims=True)

    @property
    def probs(self):
        return jax.nn.softmax(self.logits, axis=-1)

    def mode(self):
        return jnp.argmax(self.logits, axis=-1)

    def log_prob(self, value):
        return jnp.take_along_axis(self.logits, value[..., None], axis=-1)[..., 0]


def categorical_net_forward(x, params):
    """Full CategoricalNet.forward: MLP (Pallas kernel) -> Categorical head."""
    return Categorical(logits=categorical_net_logits(x, params))


# ----------------------------------------------------------------------------- reference
def categorical_net_reference_logits(x, params):
    """Plain-JAX reference mirroring the PyTorch MLP forward (highest precision)."""
    h = x
    layers = params["layers"]
    for i, (w, b) in enumerate(layers):
        h = jnp.dot(h, w, precision=jax.lax.Precision.HIGHEST) + b
        if i < len(layers) - 1:
            h = jnp.maximum(h, 0.0)
    return h


if __name__ == "__main__":
    key = jax.random.PRNGKey(0)

    # Small shapes consistent with the module: policy head over a transformer feature.
    batch = 8
    input_dim = 256
    hidden_dim = 128
    hidden_depth = 1
    action_dim = 50          # e.g. discretized action bins (padded to 128 lanes inside)

    k_params, k_x = jax.random.split(key)
    params = init_categorical_net_params(
        k_params, input_dim, action_dim=action_dim, hidden_dim=hidden_dim,
        hidden_depth=hidden_depth, last_layer_gain=0.01)

    x = jax.random.normal(k_x, (batch, input_dim), jnp.float32)

    dist = categorical_net_forward(x, params)
    logits = jax.block_until_ready(categorical_net_logits(x, params))

    ref = categorical_net_reference_logits(x, params)
    assert logits.shape == (batch, action_dim), logits.shape
    assert jnp.allclose(logits, ref, atol=1e-5, rtol=1e-4), (
        "mismatch vs reference: max abs diff "
        f"{jnp.max(jnp.abs(logits - ref))}")
    assert dist.mode().shape == (batch,)
    assert jnp.all(dist.mode() == jnp.argmax(ref, axis=-1))

    print("KERNEL_OK")
</pallas_src>

<mosaic_0001>
module attributes {stable_mosaic.version = 11 : i64} {
  func.func @_categorical_mlp_kernel(%arg0: i32, %arg1: memref<8x256xf32, #tpu.memory_space<vmem>>, %arg2: memref<256x128xf32, #tpu.memory_space<vmem>>, %arg3: memref<1x128xf32, #tpu.memory_space<vmem>>, %arg4: memref<128x128xf32, #tpu.memory_space<vmem>>, %arg5: memref<1x128xf32, #tpu.memory_space<vmem>>, %arg6: memref<8x128xf32, #tpu.memory_space<vmem>>) attributes {dimension_semantics = [#tpu.dimension_semantics<parallel>], iteration_bounds = array<i64: 1>, scalar_prefetch = 0 : i64, scratch_operands = 0 : i64, tpu.core_type = #tpu.core_type<tc>, window_params = [{transform_indices = @transform_0, window_bounds = array<i64: 8, 256>}, {pipeline_mode = #tpu.pipeline_mode<synchronous>, transform_indices = @transform_1, window_bounds = array<i64: 256, 128>}, {pipeline_mode = #tpu.pipeline_mode<synchronous>, transform_indices = @transform_2, window_bounds = array<i64: 1, 128>}, {pipeline_mode = #tpu.pipeline_mode<synchronous>, transform_indices = @transform_3, window_bounds = array<i64: 128, 128>}, {pipeline_mode = #tpu.pipeline_mode<synchronous>, transform_indices = @transform_4, window_bounds = array<i64: 1, 128>}, {transform_indices = @transform_5, window_bounds = array<i64: 8, 128>}]} {
    %c0 = arith.constant 0 : index
    %c0_0 = arith.constant 0 : index
    %0 = vector.load %arg1[%c0, %c0_0] : memref<8x256xf32, #tpu.memory_space<vmem>>, vector<8x256xf32>
    %c0_1 = arith.constant 0 : index
    %c0_2 = arith.constant 0 : index
    %1 = vector.load %arg2[%c0_1, %c0_2] : memref<256x128xf32, #tpu.memory_space<vmem>>, vector<256x128xf32>
    %cst = arith.constant dense<0.000000e+00> : vector<8x128xf32>
    %2 = tpu.matmul %0, %1, %cst {dimension_numbers = #tpu.dot_dimension_numbers<[1], [0], [0], [1], [0, 0, 1, 1], [], []>} : vector<8x256xf32>, vector<256x128xf32>, vector<8x128xf32> -> vector<8x128xf32>
    %c0_3 = arith.constant 0 : index
    %c0_4 = arith.constant 0 : index
    %3 = vector.load %arg3[%c0_3, %c0_4] : memref<1x128xf32, #tpu.memory_space<vmem>>, vector<1x128xf32>
    %4 = vector.broadcast %3 : vector<1x128xf32> to vector<8x128xf32>
    %5 = arith.addf %2, %4 : vector<8x128xf32>
    %cst_5 = arith.constant 0.000000e+00 : f32
    %6 = vector.broadcast %cst_5 : f32 to vector<8x128xf32>
    %7 = arith.maximumf %5, %6 : vector<8x128xf32>
    %c0_6 = arith.constant 0 : index
    %c0_7 = arith.constant 0 : index
    %8 = vector.load %arg4[%c0_6, %c0_7] : memref<128x128xf32, #tpu.memory_space<vmem>>, vector<128x128xf32>
    %cst_8 = arith.constant dense<0.000000e+00> : vector<8x128xf32>
    %9 = tpu.matmul %7, %8, %cst_8 {dimension_numbers = #tpu.dot_dimension_numbers<[1], [0], [0], [1], [0, 0, 1, 1], [], []>} : vector<8x128xf32>, vector<128x128xf32>, vector<8x128xf32> -> vector<8x128xf32>
    %c0_9 = arith.constant 0 : index
    %c0_10 = arith.constant 0 : index
    %10 = vector.load %arg5[%c0_9, %c0_10] : memref<1x128xf32, #tpu.memory_space<vmem>>, vector<1x128xf32>
    %11 = vector.broadcast %10 : vector<1x128xf32> to vector<8x128xf32>
    %12 = arith.addf %9, %11 : vector<8x128xf32>
    %c0_11 = arith.constant 0 : index
    %c0_12 = arith.constant 0 : index
    %13 = vector.load %arg6[%c0_11, %c0_12] : memref<8x128xf32, #tpu.memory_space<vmem>>, vector<8x128xf32>
    tpu.vector_store %arg6[%c0_11, %c0_12], %12 {strides = array<i32>} : memref<8x128xf32, #tpu.memory_space<vmem>>, vector<8x128xf32>,
    return
  }
  func.func @transform_0(%arg0: i32) -> (i32, i32) {
    %c0_i32 = arith.constant 0 : i32
    %c0_i32_0 = arith.constant 0 : i32
    return %arg0, %c0_i32 : i32, i32
  }
  func.func @transform_1(%arg0: i32) -> (i32, i32) {
    %c0_i32 = arith.constant 0 : i32
    %c0_i32_0 = arith.constant 0 : i32
    %c0_i32_1 = arith.constant 0 : i32
    return %c0_i32, %c0_i32_0 : i32, i32
  }
  func.func @transform_2(%arg0: i32) -> (i32, i32) {
    %c0_i32 = arith.constant 0 : i32
    %c0_i32_0 = arith.constant 0 : i32
    %c0_i32_1 = arith.constant 0 : i32
    return %c0_i32, %c0_i32_0 : i32, i32
  }
  func.func @transform_3(%arg0: i32) -> (i32, i32) {
    %c0_i32 = arith.constant 0 : i32
    %c0_i32_0 = arith.constant 0 : i32
    %c0_i32_1 = arith.constant 0 : i32
    return %c0_i32, %c0_i32_0 : i32, i32
  }
  func.func @transform_4(%arg0: i32) -> (i32, i32) {
    %c0_i32 = arith.constant 0 : i32
    %c0_i32_0 = arith.constant 0 : i32
    %c0_i32_1 = arith.constant 0 : i32
    return %c0_i32, %c0_i32_0 : i32, i32
  }
  func.func @transform_5(%arg0: i32) -> (i32, i32) {
    %c0_i32 = arith.constant 0 : i32
    %c0_i32_0 = arith.constant 0 : i32
    return %arg0, %c0_i32 : i32, i32
  }
}

</mosaic_0001>

<bundles_post_ra>
// kernel: tpu_custom_call.1
= control target key start
LH: loop header
LB: loop body
LE: loop exit
PB: predicated region body
PF: predicated region fallthrough
CT: control target
= control target key end

     0   :  { %10 = vsyncpa [#allocation3], 0  ;;  %s538_s0 = inlined_call_operand.hbm [shape: f32[8,256], index: 0, kind: input, shape index: {}]   ;;  %s539_s1 = inlined_call_operand.hbm [shape: f32[256,128], index: 1, kind: input, shape index: {}]   ;;  %s540_s2 = inlined_call_operand.vmem [shape: f32[1,128], index: 2, kind: input, shape index: {}]   ;;  %s541_s3 = inlined_call_operand.hbm [shape: f32[128,128], index: 3, kind: input, shape index: {}]   ;;  %s542_s4 = inlined_call_operand.vmem [shape: f32[1,128], index: 4, kind: input, shape index: {}]   ;;  %s543_s5 = inlined_call_operand.hbm [shape: f32[8,128], index: 5, kind: output, shape index: {}]  }
   0x1   :  { %11 = vsyncpa [#allocation6], 0 }
   0x2   :  { %12 = vsyncpa [#allocation4], 0  ;;  %s465_s18 = smov [#allocation5]  }
   0x3   :  { %s28_s19 = sshll.u32 %s465_s18, 4  ;;  %s29_s19 = int_to_ptr.vmem [resolvable:$true] %s28_s19 }
   0x4   :  { %s387_s20 = scalar_lea.vmem %s29_s19, 4096  ;;  %p392_p1 = scmp.lt.s32.totalorder %s29_s19, %s29_s19 }
   0x5   :  { %p388_p0 = scmp.ne.s32.totalorder %s29_s19, %s387_s20  ;;  %p393_p2 = scmp.lt.s32.totalorder %s387_s20, %s387_s20 }
   0x7   :  { %p394_p3 = por %p393_p2, %p392_p1 }
   0x9   :  { %p395_p4 = pnand %p394_p3, %p388_p0 }
   0xb   :  { %398 = shalt.err (!%p395_p4)
}
   0xc   :  { %s466_s21 = smov 128   ;;  %s467_s22 = smov 8  }
   0xd   :  { %34 = dma.hbm_to_vmem [thread:$0]  %s539_s1, 4096, %s29_s19, [#allocation6], %s466_s21, %s466_s21, %s467_s22  }
   0xe   :  { %s468_s25 = smov [#allocation2]   ;;  %s469_s27 = smov [#allocation7]  }
   0xf   :  { %s19_s26 = sshll.u32 %s468_s25, 4  ;;  %s42_s28 = sshll.u32 %s469_s27, 4  ;;  %s20_s26 = int_to_ptr.vmem [resolvable:$true] %s19_s26  ;;  %s43_s28 = int_to_ptr.vmem [resolvable:$true] %s42_s28 }
  0x10   :  { %s407_s29 = scalar_lea.vmem %s20_s26, 256  ;;  %p412_p6 = scmp.lt.s32.totalorder %s20_s26, %s20_s26 }
  0x11   :  { %p408_p5 = scmp.ne.s32.totalorder %s20_s26, %s407_s29  ;;  %p413_p7 = scmp.lt.s32.totalorder %s407_s29, %s407_s29 }
  0x13   :  { %p414_p8 = por %p413_p7, %p412_p6 }
  0x15   :  { %p415_p9 = pnand %p414_p8, %p408_p5 }
  0x17   :  { %418 = shalt.err (!%p415_p9)
}
  0x18   :  { %22 = dma.hbm_to_vmem [thread:$0]  %s538_s0, 256, %s20_s26, [#allocation3]  }
  0x19   :  { %s427_s7 = scalar_lea.vmem %s43_s28, 2048  ;;  %p432_p11 = scmp.lt.s32.totalorder %s43_s28, %s43_s28 }
  0x1a   :  { %p428_p10 = scmp.ne.s32.totalorder %s43_s28, %s427_s7  ;;  %p433_p12 = scmp.lt.s32.totalorder %s427_s7, %s427_s7 }
  0x1c   :  { %p434_p13 = por %p433_p12, %p432_p11 }
  0x1e   :  { %p435_p0 = pnand %p434_p13, %p428_p10 }
  0x20   :  { %438 = shalt.err (!%p435_p0)
}
  0x21   :  { %48 = dma.hbm_to_vmem [thread:$0]  %s541_s3, 2048, %s43_s28, [#allocation6], %s466_s21, %s466_s21, %s467_s22  }
  0x22   :  { %459 = dma.done.wait [#allocation3], 256  }
  0x23   :  { %460 = vsyncadd [#allocation3], 4294967040 }
  0x24   :  { %461 = dma.done.wait [#allocation6], 6144  }
  0x25   :  { %462 = vsyncadd [#allocation6], 4294961152  ;;  %v470_v0 = vmov 0.0   ;;  %v93_v1 = vld [vmem:[#allocation5 + $0xf8] sm:$0xff]  ;;  %v92_v3 = vld [vmem:[#allocation5 + $0xf0] sm:$0xff]  ;;  %vm471_vm0 = vmmov 0  }
  0x26   :  { %336 = vmatprep.subr.mxu1 %v470_v0  ;;  %v77_v2 = vld [vmem:[#allocation5 + $0x78] sm:$0xff]  ;;  %284 = vmatprep.subr.mxu0 %v93_v1  ;;  %v76_v4 = vld [vmem:[#allocation5 + $0x70] sm:$0xff]  ;;  %v91_v5 = vld [vmem:[#allocation5 + $0xe8] sm:$0xff]  ;;  %s472_s11 = smov [#allocation8]  }
  0x27   :  { %285 = vmatpush3.msra.mxu0 %v77_v2  ;;  %v75_v6 = vld [vmem:[#allocation5 + $0x68] sm:$0xff]  ;;  %v90_v7 = vld [vmem:[#allocation5 + $0xe0] sm:$0xff]  ;;  %v89_v9 = vld [vmem:[#allocation5 + $0xd8] sm:$0xff]  ;;  %368 = vmatprep.mubr.msk.f32.mxu1 %vm471_vm0, %v470_v0  ;;  %s272_s12 = sshll.u32 %s472_s11, 4  ;;  %s273_s12 = int_to_ptr.vmem [resolvable:$true] %s272_s12 }
  0x28   :  { %286 = vmatprep.subr.mxu0 %v92_v3  ;;  %v74_v8 = vld [vmem:[#allocation5 + $0x60] sm:$0xff]  ;;  %v73_v10 = vld [vmem:[#allocation5 + $0x58] sm:$0xff]  ;;  %v88_v11 = vld [vmem:[#allocation5 + $0xd0] sm:$0xff]  ;;  %s439_s13 = scalar_lea.vmem %s273_s12, 128  ;;  %p444_p2 = scmp.lt.s32.totalorder %s273_s12, %s273_s12 }
  0x29   :  { %287 = vmatpush3.msra.mxu0 %v76_v4  ;;  %v72_v12 = vld [vmem:[#allocation5 + $0x50] sm:$0xff]  ;;  %v87_v13 = vld [vmem:[#allocation5 + $0xc8] sm:$0xff]  ;;  %v61_v14 = vld [vmem:[#allocation2 + $0x8] sm:$0xff]  ;;  %p440_p1 = scmp.ne.s32.totalorder %s273_s12, %s439_s13  ;;  %p445_p3 = scmp.lt.s32.totalorder %s439_s13, %s439_s13 }
  0x2a   :  { %288 = vmatprep.subr.mxu0 %v91_v5  ;;  %v71_v15 = vld [vmem:[#allocation5 + $0x48] sm:$0xff]  ;;  %165 = vmatprep.mubr.f32.mxu0 %v61_v14  ;;  %v187_v16 = vld [vmem:[#allocation7 + $0x78] sm:$0xff]  ;;  %v186_v17 = vld [vmem:[#allocation7 + $0x70] sm:$0xff] }
  0x2b   :  { %289 = vmatpush3.msra.mxu0 %v75_v6  ;;  %v86_v18 = vld [vmem:[#allocation5 + $0xc0] sm:$0xff]  ;;  %337 = vmatpush3.msra.mxu1 %v187_v16  ;;  %v185_v20 = vld [vmem:[#allocation7 + $0x68] sm:$0xff]  ;;  %v85_v21 = vld [vmem:[#allocation5 + $0xb8] sm:$0xff]  ;;  %p446_p4 = por %p445_p3, %p444_p2 }
  0x2c   :  { %290 = vmatprep.subr.mxu0 %v90_v7  ;;  %v70_v19 = vld [vmem:[#allocation5 + $0x40] sm:$0xff]  ;;  %338 = vmatprep.subr.mxu1 %v470_v0  ;;  %v69_v22 = vld [vmem:[#allocation5 + $0x38] sm:$0xff]  ;;  %v84_v24 = vld [vmem:[#allocation5 + $0xb0] sm:$0xff] }
  0x2d   :  { %291 = vmatpush3.msra.mxu0 %v74_v8  ;;  %339 = vmatpush3.msra.mxu1 %v186_v17  ;;  %v184_v23 = vld [vmem:[#allocation7 + $0x60] sm:$0xff]  ;;  %v68_v25 = vld [vmem:[#allocation5 + $0x30] sm:$0xff]  ;;  %v183_v26 = vld [vmem:[#allocation7 + $0x58] sm:$0xff]  ;;  %p447_p5 = pnand %p446_p4, %p440_p1 }
  0x2e   :  { %292 = vmatprep.subr.mxu0 %v89_v9  ;;  %340 = vmatprep.subr.mxu1 %v470_v0  ;;  %v83_v27 = vld [vmem:[#allocation5 + $0xa8] sm:$0xff]  ;;  %v182_v29 = vld [vmem:[#allocation7 + $0x50] sm:$0xff]  ;;  %v82_v30 = vld [vmem:[#allocation5 + $0xa0] sm:$0xff] }
  0x2f   :  { %293 = vmatpush3.msra.mxu0 %v73_v10  ;;  %341 = vmatpush3.msra.mxu1 %v185_v20  ;;  %v67_v28 = vld [vmem:[#allocation5 + $0x28] sm:$0xff]  ;;  %v66_v31 = vld [vmem:[#allocation5 + $0x20] sm:$0xff]  ;;  %v81_v33 = vld [vmem:[#allocation5 + $0x98] sm:$0xff] }
  0x30   :  { %294 = vmatprep.subr.mxu0 %v88_v11  ;;  %342 = vmatprep.subr.mxu1 %v470_v0  ;;  %v181_v32 = vld [vmem:[#allocation7 + $0x48] sm:$0xff]  ;;  %v65_v34 = vld [vmem:[#allocation5 + $0x18] sm:$0xff]  ;;  %v180_v35 = vld [vmem:[#allocation7 + $0x40] sm:$0xff] }
  0x31   :  { %295 = vmatpush3.msra.mxu0 %v72_v12  ;;  %343 = vmatpush3.msra.mxu1 %v184_v23  ;;  %v80_v36 = vld [vmem:[#allocation5 + $0x90] sm:$0xff]  ;;  %v179_v38 = vld [vmem:[#allocation7 + $0x38] sm:$0xff]  ;;  %v79_v39 = vld [vmem:[#allocation5 + $0x88] sm:$0xff] }
  0x32   :  { %296 = vmatprep.subr.mxu0 %v87_v13  ;;  %344 = vmatprep.subr.mxu1 %v470_v0  ;;  %v64_v37 = vld [vmem:[#allocation5 + $0x10] sm:$0xff]  ;;  %v63_v40 = vld [vmem:[#allocation5 + $0x8] sm:$0xff]  ;;  %v78_v42 = vld [vmem:[#allocation5 + $0x80] sm:$0xff] }
  0x33   :  { %297 = vmatpush3.msra.mxu0 %v71_v15  ;;  %345 = vmatpush3.msra.mxu1 %v183_v26  ;;  %v178_v41 = vld [vmem:[#allocation7 + $0x30] sm:$0xff]  ;;  %v62_v43 = vld [vmem:[#allocation5] sm:$0xff]  ;;  %v177_v44 = vld [vmem:[#allocation7 + $0x28] sm:$0xff] }
  0x34   :  { %298 = vmatprep.subr.mxu0 %v86_v18  ;;  %346 = vmatprep.subr.mxu1 %v470_v0  ;;  %v60_v45 = vld [vmem:[#allocation2] sm:$0xff]  ;;  %v176_v46 = vld [vmem:[#allocation7 + $0x20] sm:$0xff]  ;;  %v175_v47 = vld [vmem:[#allocation7 + $0x18] sm:$0xff] }
  0x35   :  { %299 = vmatpush3.msra.mxu0 %v70_v19  ;;  %347 = vmatpush3.msra.mxu1 %v182_v29  ;;  %v174_v48 = vld [vmem:[#allocation7 + $0x10] sm:$0xff]  ;;  %v173_v49 = vld [vmem:[#allocation7 + $0x8] sm:$0xff]  ;;  %v172_v50 = vld [vmem:[#allocation7] sm:$0xff] }
  0x36   :  { %300 = vmatprep.subr.mxu0 %v85_v21  ;;  %348 = vmatprep.subr.mxu1 %v470_v0  ;;  %v282_v52 = vld [vmem:[%s540_s2] ss:$0 sm:$0xff] }
  0x37   :  { %301 = vmatpush3.msra.mxu0 %v69_v22  ;;  %349 = vmatpush3.msra.mxu1 %v181_v32  ;;  %v283_v57 = vld [vmem:[%s542_s4] ss:$0 sm:$0xff] }
  0x38   :  { %302 = vmatprep.subr.mxu0 %v84_v24  ;;  %350 = vmatprep.subr.mxu1 %v470_v0 }
  0x39   :  { %303 = vmatpush3.msra.mxu0 %v68_v25  ;;  %351 = vmatpush3.msra.mxu1 %v180_v35 }
  0x3a   :  { %304 = vmatprep.subr.mxu0 %v83_v27  ;;  %352 = vmatprep.subr.mxu1 %v470_v0 }
  0x3b   :  { %305 = vmatpush3.msra.mxu0 %v67_v28  ;;  %353 = vmatpush3.msra.mxu1 %v179_v38 }
  0x3c   :  { %306 = vmatprep.subr.mxu0 %v82_v30  ;;  %354 = vmatprep.subr.mxu1 %v470_v0 }
  0x3d   :  { %307 = vmatpush3.msra.mxu0 %v66_v31  ;;  %355 = vmatpush3.msra.mxu1 %v178_v41 }
  0x3e   :  { %308 = vmatprep.subr.mxu0 %v81_v33  ;;  %356 = vmatprep.subr.mxu1 %v470_v0 }
  0x3f   :  { %309 = vmatpush3.msra.mxu0 %v65_v34  ;;  %357 = vmatpush3.msra.mxu1 %v177_v44 }
  0x40   :  { %310 = vmatprep.subr.mxu0 %v80_v36  ;;  %358 = vmatprep.subr.mxu1 %v470_v0 }
  0x41   :  { %311 = vmatpush3.msra.mxu0 %v64_v37  ;;  %359 = vmatpush3.msra.mxu1 %v176_v46 }
  0x42   :  { %312 = vmatprep.subr.mxu0 %v79_v39  ;;  %360 = vmatprep.subr.mxu1 %v470_v0 }
  0x43   :  { %313 = vmatpush3.msra.mxu0 %v63_v40  ;;  %361 = vmatpush3.msra.mxu1 %v175_v47 }
  0x44   :  { %314 = vmatprep.subr.mxu0 %v78_v42  ;;  %362 = vmatprep.subr.mxu1 %v470_v0 }
  0x45   :  { %315 = vmatpush3.msra.mxu0 %v62_v43  ;;  %363 = vmatpush3.msra.mxu1 %v174_v48 }
  0x46   :  { %166 = vmatmul.mubr.f32.vlgmr.msra.gmra.mxu0 %v60_v45  ;;  %364 = vmatprep.subr.mxu1 %v470_v0 }
  0x47   :  { %365 = vmatpush3.msra.mxu1 %v173_v49 }
  0x48   :  { %366 = vmatprep.subr.mxu1 %v470_v0 }
  0x49   :  { %367 = vmatpush3.msra.mxu1 %v172_v50 }
 0x106   :  { %v316_v51 = vpop.f32.mrf.mxu0 }
 0x108   :  { %v317_v53 = vpop.f32.mrf.mxu0 }
 0x109   :  { %v318_v54 = vadd.f32 %v317_v53, %v316_v51 }
 0x10b   :  { %v168_v55 = vadd.f32 %v318_v54, %v282_v52 }
 0x10d   :  { %v171_v56 = vmax.f32 %v168_v55, 0.0 }
 0x10f   :  { %369 = vmatmul.mubr.f32.vlgmr.msra.gmra.mxu1 %v171_v56 }
 0x1cf   :  { %v261_v58 = vpop.f32.mrf.mxu1 }
 0x1d0   :  { %v262_v59 = vadd.f32 %v283_v57, %v261_v58 }
 0x1d1   :  { %v370_v60 = vpop.f32.mrf.mxu1 }
 0x1d2   :  { %265 = vst [vmem:[#allocation8] sm:$0xff] %v262_v59 }
 0x1d3   :  { %450 = shalt.err (!%p447_p5)
}
 0x1d4   :  { %275 = dma.vmem_to_hbm [thread:$0]  %s273_s12, 128, %s543_s5, [#allocation4]  }
 0x1d5   :  { %463 = dma.done.wait [#allocation4], 128  }
 0x1d6   :  { %464 = vsyncadd [#allocation4], 4294967168 }
 0x1d7   :  { %279 = vsyncpa [#allocation3], 1 }
 0x1d8   :  { %280 = vsyncpa [#allocation6], 1 }
 0x1d9   :  { %281 = vsyncpa [#allocation4], 1 }

</bundles_post_ra>
